<compile_context>
chip_gen: v5e
topology: v5e:2x2
jax: 0.10.0
libtpu: 0.0.40
codegen_flags: <defaults>
</compile_context>

<pallas_src>
import functools

import jax
import jax.numpy as jnp
from jax import lax
from jax.experimental import pallas as pl
from jax.experimental.pallas import tpu as pltpu


def ffn_relu_kernel(x_ref, w0_ref, w1_ref, o_ref, *, compute_dtype):
    # x_ref: (TM, E), w0_ref: (H, E)  [PyTorch layout], w1_ref: (E, H), o_ref: (TM, E)
    x = x_ref[...]
    w0 = w0_ref[...]
    w1 = w1_ref[...]
    if compute_dtype is not None:
        x = x.astype(compute_dtype)
        w0 = w0.astype(compute_dtype)
        w1 = w1.astype(compute_dtype)

    # Contract the feature axis of x with the `in_features` (last) axis of the
    # weight, i.e. x @ w.T, without materializing a transpose.
    dn = (((1,), (1,)), ((), ()))
    h = lax.dot_general(x, w0, dn, preferred_element_type=jnp.float32)  # (TM, H)
    h = jnp.maximum(h, 0.0)  # ReLU (f32 on the VPU)
    if compute_dtype is not None:
        h = h.astype(compute_dtype)
    y = lax.dot_general(h, w1, dn, preferred_element_type=jnp.float32)  # (TM, E)
    o_ref[...] = y.astype(o_ref.dtype)


def feed_forward_relu(x, w0, w1, *, block_m=512, compute_dtype=jnp.bfloat16):
    """x: (..., E); w0: (H, E); w1: (E, H)  (PyTorch nn.Linear weight layout).

    Returns (..., E).  compute_dtype=None runs the matmuls with f32 operands
    (bit-faithful to the torch module); compute_dtype=jnp.bfloat16 feeds the
    MXU bf16 operands with f32 accumulation (recommended on v6e/v7x).
    NOTE: for tiny M this whole problem is overhead-dominated; batch many rows
    per call (or let XLA fuse it) to amortize the pallas_call.
    """
    orig_shape = x.shape
    E = orig_shape[-1]
    H = w0.shape[0]
    assert w0.shape == (H, E) and w1.shape == (E, H)

    x2 = x.reshape(-1, E)
    M = x2.shape[0]

    # Large row tiles (>=512) get close to the HBM roofline; if M is smaller
    # than a tile, fall back to a single full-extent block (satisfies the
    # (8,128) constraint via the "equal to full array dim" clause).
    tm = block_m if M >= block_m else M
    grid = (pl.cdiv(M, tm),)

    kernel = functools.partial(ffn_relu_kernel, compute_dtype=compute_dtype)

    out = pl.pallas_call(
        kernel,
        out_shape=jax.ShapeDtypeStruct((M, E), x.dtype),
        grid=grid,
        in_specs=[
            pl.BlockSpec((tm, E), lambda i: (i, 0)),   # x rows, pipelined over M
            pl.BlockSpec((H, E), lambda i: (0, 0)),    # layer0.weight, resident
            pl.BlockSpec((E, H), lambda i: (0, 0)),    # layer1.weight, resident
        ],
        out_specs=pl.BlockSpec((tm, E), lambda i: (i, 0)),
        compiler_params=pltpu.CompilerParams(
            dimension_semantics=("parallel",),          # rows are independent
            vmem_limit_bytes=32 * 1024 * 1024,          # stay inside v7x VMEM
        ),
    )(x2, w0, w1)
    return out.reshape(orig_shape)


if __name__ == "__main__":
    # Module hyperparameters (consistent with the PyTorch module).
    alphabet_size = 4
    sequence_length = 10
    E = alphabet_size + sequence_length + 2   # embedding_length = 16
    H = 4 * E                                 # hidden_dim = 64

    # Enough rows (M = 2048) to exercise multiple 512-row grid steps while
    # staying small.
    batch, seq = 8, 256

    key = jax.random.PRNGKey(0)
    kx, k0, k1 = jax.random.split(key, 3)

    # Deterministic synthetic parameters (PyTorch Linear weight shapes).
    x = jax.random.normal(kx, (batch, seq, E), dtype=jnp.float32)
    w0 = jax.random.normal(k0, (H, E), dtype=jnp.float32) * 0.1  # layer0.weight
    w1 = jax.random.normal(k1, (E, H), dtype=jnp.float32) * 0.1  # layer1.weight

    # Reference: same math as the torch forward.
    y_ref = jnp.maximum(x @ w0.T, 0.0) @ w1.T

    # 1) f32 operand path — bit-faithful to the module's forward.
    y_f32 = jax.block_until_ready(feed_forward_relu(x, w0, w1, compute_dtype=None))
    assert y_f32.shape == (batch, seq, E)
    assert jnp.allclose(y_f32, y_ref, atol=1e-5, rtol=1e-5)

    # 2) bf16 MXU-operand path (perf path per review) — looser tolerance.
    y_bf16 = jax.block_until_ready(
        feed_forward_relu(x, w0, w1, compute_dtype=jnp.bfloat16))
    assert y_bf16.shape == (batch, seq, E)
    assert jnp.allclose(y_bf16, y_ref, atol=5e-2, rtol=5e-2)

    print("KERNEL_OK")
</pallas_src>

<mosaic_0001>
module attributes {stable_mosaic.version = 11 : i64} {
  func.func @ffn_relu_kernel(%arg0: i32, %arg1: memref<512x16xf32, #tpu.memory_space<vmem>>, %arg2: memref<64x16xf32, #tpu.memory_space<vmem>>, %arg3: memref<16x64xf32, #tpu.memory_space<vmem>>, %arg4: memref<512x16xf32, #tpu.memory_space<vmem>>) attributes {dimension_semantics = [#tpu.dimension_semantics<parallel>], iteration_bounds = array<i64: 4>, scalar_prefetch = 0 : i64, scratch_operands = 0 : i64, tpu.core_type = #tpu.core_type<tc>, window_params = [{transform_indices = @transform_0, window_bounds = array<i64: 512, 16>}, {pipeline_mode = #tpu.pipeline_mode<synchronous>, transform_indices = @transform_1, window_bounds = array<i64: 64, 16>}, {pipeline_mode = #tpu.pipeline_mode<synchronous>, transform_indices = @transform_2, window_bounds = array<i64: 16, 64>}, {transform_indices = @transform_3, window_bounds = array<i64: 512, 16>}]} {
    %c0 = arith.constant 0 : index
    %c0_0 = arith.constant 0 : index
    %0 = vector.load %arg1[%c0, %c0_0] : memref<512x16xf32, #tpu.memory_space<vmem>>, vector<512x16xf32>
    %c0_1 = arith.constant 0 : index
    %c0_2 = arith.constant 0 : index
    %1 = vector.load %arg2[%c0_1, %c0_2] : memref<64x16xf32, #tpu.memory_space<vmem>>, vector<64x16xf32>
    %c0_3 = arith.constant 0 : index
    %c0_4 = arith.constant 0 : index
    %2 = vector.load %arg3[%c0_3, %c0_4] : memref<16x64xf32, #tpu.memory_space<vmem>>, vector<16x64xf32>
    %cst = arith.constant dense<0.000000e+00> : vector<512x64xf32>
    %3 = tpu.matmul %0, %1, %cst {dimension_numbers = #tpu.dot_dimension_numbers<[1], [1], [0], [0], [0, 0, 1, 0], [], []>} : vector<512x16xf32>, vector<64x16xf32>, vector<512x64xf32> -> vector<512x64xf32>
    %cst_5 = arith.constant 0.000000e+00 : f32
    %4 = vector.broadcast %cst_5 : f32 to vector<512x64xf32>
    %5 = arith.maximumf %3, %4 : vector<512x64xf32>
    %cst_6 = arith.constant dense<0.000000e+00> : vector<512x16xf32>
    %6 = tpu.matmul %5, %2, %cst_6 {dimension_numbers = #tpu.dot_dimension_numbers<[1], [1], [0], [0], [0, 0, 1, 0], [], []>} : vector<512x64xf32>, vector<16x64xf32>, vector<512x16xf32> -> vector<512x16xf32>
    %c0_7 = arith.constant 0 : index
    %c0_8 = arith.constant 0 : index
    %7 = vector.load %arg4[%c0_7, %c0_8] : memref<512x16xf32, #tpu.memory_space<vmem>>, vector<512x16xf32>
    tpu.vector_store %arg4[%c0_7, %c0_8], %6 {strides = array<i32>} : memref<512x16xf32, #tpu.memory_space<vmem>>, vector<512x16xf32>,
    return
  }
  func.func @transform_0(%arg0: i32) -> (i32, i32) {
    %c0_i32 = arith.constant 0 : i32
    %c0_i32_0 = arith.constant 0 : i32
    return %arg0, %c0_i32 : i32, i32
  }
  func.func @transform_1(%arg0: i32) -> (i32, i32) {
    %c0_i32 = arith.constant 0 : i32
    %c0_i32_0 = arith.constant 0 : i32
    %c0_i32_1 = arith.constant 0 : i32
    return %c0_i32, %c0_i32_0 : i32, i32
  }
  func.func @transform_2(%arg0: i32) -> (i32, i32) {
    %c0_i32 = arith.constant 0 : i32
    %c0_i32_0 = arith.constant 0 : i32
    %c0_i32_1 = arith.constant 0 : i32
    return %c0_i32, %c0_i32_0 : i32, i32
  }
  func.func @transform_3(%arg0: i32) -> (i32, i32) {
    %c0_i32 = arith.constant 0 : i32
    %c0_i32_0 = arith.constant 0 : i32
    return %arg0, %c0_i32 : i32, i32
  }
}

</mosaic_0001>

<bundles_post_ra>
// kernel: tpu_custom_call.1
= control target key start
LH: loop header
LB: loop body
LE: loop exit
PB: predicated region body
PF: predicated region fallthrough
CT: control target
= control target key end

     0   :  { %s1469_s12 = smov 0   ;;  %s1887_s0 = inlined_call_operand.vmem [shape: f32[2048,16], index: 0, kind: input, shape index: {}]   ;;  %s1888_s1 = inlined_call_operand.vmem [shape: f32[64,16], index: 1, kind: input, shape index: {}]   ;;  %s1889_s2 = inlined_call_operand.vmem [shape: f32[16,64], index: 2, kind: input, shape index: {}]   ;;  %s1890_s3 = inlined_call_operand.vmem [shape: f32[2048,16], index: 3, kind: output, shape index: {}]  }
   0x1 LB: > { %s1266_s13 = sadd.s32 4294967295, %s1447_s12   ;;  %p1270_p0 = scmp.ge.s32.totalorder %s1447_s12, 1  ;;  %s1447_s12 = sphi %s1469_s12, %s13_s12  }
   0x2   : > { %p138_p1 = scmp.lt.s32.totalorder %s1447_s12, 5 }
   0x4   : > { %p139_p2 = pnand %p1270_p0, %p138_p1 }
   0x5   : > { %s1271_s22 = sshll.u32 (!%p139_p2), %s1266_s13, 6 }
   0x6   : > { %142 = sbr.rel (%p139_p2) target bundleno = 566 (0x236), region = 32  ;;  %p163_p3 = scmp.lt.s32.totalorder (!%p139_p2), %s1271_s22, 255 }
   0xb   : > { %v245_v0 = vld [vmem:[%s1888_s1 + $0x38] sm:$0xff]  ;;  %vm248_vm0 = vcmask 130048   ;;  %v244_v1 = vld [vmem:[%s1888_s1 + $0x30] sm:$0xff]  ;;  %v243_v2 = vld [vmem:[%s1888_s1 + $0x28] sm:$0xff]  ;;  %s1892_s22 = smov (!%p163_p3, %s1271_s22), 255  ;;  %vm738_vm1 = vcmask 523264  }
   0xc   : > { %1275 = vmatpush.xpose.msk.msra.mxu0 %vm248_vm0, %v245_v0  ;;  %1415 = vmatpush.xpose.msk.msra.mxu2 %vm248_vm0, %v245_v0  ;;  %v242_v3 = vld [vmem:[%s1888_s1 + $0x20] sm:$0xff]  ;;  %v241_v4 = vld [vmem:[%s1888_s1 + $0x18] sm:$0xff]  ;;  %v240_v5 = vld [vmem:[%s1888_s1 + $0x10] sm:$0xff]  ;;  %s1272_s29 = sshll.u32 %s1892_s22, 3 }
   0xd   : > { %1416 = vmatpush.xpose.msk.msra.mxu3 %vm248_vm0, %v245_v0  ;;  %v239_v6 = vld [vmem:[%s1888_s1 + $0x8] sm:$0xff]  ;;  %v238_v7 = vld [vmem:[%s1888_s1] sm:$0xff]  ;;  %s1529_s7 = scalar_lea.vmem %s1887_s0, %s1272_s29  ;;  %s1712_s15 = scalar_lea.vmem %s1890_s3, %s1272_s29 }
   0xe   : > { %v174_v8 = vld [vmem:[%s1529_s7] sm:$0xff]  ;;  %v205_v9 = vld [vmem:[%s1529_s7 + $0xf8] sm:$0xff]  ;;  %v175_v10 = vld [vmem:[%s1529_s7 + $0x8] sm:$0xff] }
   0xf   : > { %v206_v11 = vld [vmem:[%s1529_s7 + $0x100] sm:$0xff]  ;;  %v176_v12 = vld [vmem:[%s1529_s7 + $0x10] sm:$0xff]  ;;  %v207_v13 = vld [vmem:[%s1529_s7 + $0x108] sm:$0xff] }
  0x10   : > { %1276 = vmatpush.xpose.msk.msra.mxu0 %vm248_vm0, %v244_v1  ;;  %1417 = vmatpush.xpose.msk.msra.mxu2 %vm248_vm0, %v244_v1  ;;  %v177_v14 = vld [vmem:[%s1529_s7 + $0x18] sm:$0xff]  ;;  %v208_v15 = vld [vmem:[%s1529_s7 + $0x110] sm:$0xff]  ;;  %v178_v16 = vld [vmem:[%s1529_s7 + $0x20] sm:$0xff] }
  0x11   : > { %1418 = vmatpush.xpose.msk.msra.mxu3 %vm248_vm0, %v244_v1  ;;  %v209_v17 = vld [vmem:[%s1529_s7 + $0x118] sm:$0xff]  ;;  %v179_v18 = vld [vmem:[%s1529_s7 + $0x28] sm:$0xff]  ;;  %v210_v19 = vld [vmem:[%s1529_s7 + $0x120] sm:$0xff] }
  0x12   : > { %v180_v20 = vld [vmem:[%s1529_s7 + $0x30] sm:$0xff]  ;;  %v211_v21 = vld [vmem:[%s1529_s7 + $0x128] sm:$0xff]  ;;  %v181_v22 = vld [vmem:[%s1529_s7 + $0x38] sm:$0xff] }
  0x13   : > { %v212_v23 = vld [vmem:[%s1529_s7 + $0x130] sm:$0xff]  ;;  %v182_v24 = vld [vmem:[%s1529_s7 + $0x40] sm:$0xff]  ;;  %v213_v25 = vld [vmem:[%s1529_s7 + $0x138] sm:$0xff] }
  0x14   : > { %1277 = vmatpush.xpose.msk.msra.mxu0 %vm248_vm0, %v243_v2  ;;  %1419 = vmatpush.xpose.msk.msra.mxu2 %vm248_vm0, %v243_v2  ;;  %v183_v26 = vld [vmem:[%s1529_s7 + $0x48] sm:$0xff]  ;;  %v214_v27 = vld [vmem:[%s1529_s7 + $0x140] sm:$0xff]  ;;  %v184_v28 = vld [vmem:[%s1529_s7 + $0x50] sm:$0xff] }
  0x15   : > { %1420 = vmatpush.xpose.msk.msra.mxu3 %vm248_vm0, %v243_v2  ;;  %v215_v29 = vld [vmem:[%s1529_s7 + $0x148] sm:$0xff]  ;;  %v185_v30 = vld [vmem:[%s1529_s7 + $0x58] sm:$0xff]  ;;  %v216_v31 = vld [vmem:[%s1529_s7 + $0x150] sm:$0xff] }
  0x16   : > { %v247_v32 = vld [vmem:[%s1889_s2 + $0x8] sm:$0xff]  ;;  %v246_v33 = vld [vmem:[%s1889_s2] sm:$0xff]  ;;  %v217_v35 = vld [vmem:[%s1529_s7 + $0x158] sm:$0xff] }
  0x17   : > { %1347 = vmatpush.xpose.msk.msra.mxu1 %vm738_vm1, %v247_v32  ;;  %v186_v34 = vld [vmem:[%s1529_s7 + $0x60] sm:$0xff]  ;;  %v187_v36 = vld [vmem:[%s1529_s7 + $0x68] sm:$0xff]  ;;  %v188_v38 = vld [vmem:[%s1529_s7 + $0x70] sm:$0xff] }
  0x18   : > { %1278 = vmatpush.xpose.msk.msra.mxu0 %vm248_vm0, %v242_v3  ;;  %1421 = vmatpush.xpose.msk.msra.mxu2 %vm248_vm0, %v242_v3  ;;  %v218_v37 = vld [vmem:[%s1529_s7 + $0x160] sm:$0xff]  ;;  %v219_v39 = vld [vmem:[%s1529_s7 + $0x168] sm:$0xff]  ;;  %v189_v40 = vld [vmem:[%s1529_s7 + $0x78] sm:$0xff] }
  0x19   : > { %1422 = vmatpush.xpose.msk.msra.mxu3 %vm248_vm0, %v242_v3  ;;  %v220_v41 = vld [vmem:[%s1529_s7 + $0x170] sm:$0xff]  ;;  %v237_v42 = vld [vmem:[%s1529_s7 + $0x1f8] sm:$0xff]  ;;  %v190_v44 = vld [vmem:[%s1529_s7 + $0x80] sm:$0xff] }
  0x1a   : > { %v221_v45 = vld [vmem:[%s1529_s7 + $0x178] sm:$0xff]  ;;  %v191_v49 = vld [vmem:[%s1529_s7 + $0x88] sm:$0xff]  ;;  %v222_v50 = vld [vmem:[%s1529_s7 + $0x180] sm:$0xff] }
  0x1b   : > { %1348 = vmatpush.xpose.msk.msra.mxu1 %vm738_vm1, %v246_v33  ;;  %v192_v54 = vld [vmem:[%s1529_s7 + $0x90] sm:$0xff]  ;;  %v223_v55 = vld [vmem:[%s1529_s7 + $0x188] sm:$0xff]  ;;  %v193_v59 = vld [vmem:[%s1529_s7 + $0x98] sm:$0xff] }
  0x1c   : > { %1279 = vmatpush.xpose.msk.msra.mxu0 %vm248_vm0, %v241_v4  ;;  %1423 = vmatpush.xpose.msk.msra.mxu2 %vm248_vm0, %v241_v4  ;;  %v224_v60 = vld [vmem:[%s1529_s7 + $0x190] sm:$0xff]  ;;  %v194_v1 = vld [vmem:[%s1529_s7 + $0xa0] sm:$0xff]  ;;  %v225_v2 = vld [vmem:[%s1529_s7 + $0x198] sm:$0xff] }
  0x1d   : > { %1424 = vmatpush.xpose.msk.msra.mxu3 %vm248_vm0, %v241_v4 }
  0x20   : > { %1280 = vmatpush.xpose.msk.msra.mxu0 %vm248_vm0, %v240_v5  ;;  %1425 = vmatpush.xpose.msk.msra.mxu2 %vm248_vm0, %v240_v5 }
  0x21   : > { %1426 = vmatpush.xpose.msk.msra.mxu3 %vm248_vm0, %v240_v5 }
  0x24   : > { %1281 = vmatpush.xpose.msk.msra.mxu0 %vm248_vm0, %v239_v6  ;;  %1427 = vmatpush.xpose.msk.msra.mxu2 %vm248_vm0, %v239_v6 }
  0x25   : > { %1428 = vmatpush.xpose.msk.msra.mxu3 %vm248_vm0, %v239_v6 }
  0x28   : > { %1282 = vmatpush.xpose.msk.msra.mxu0 %vm248_vm0, %v238_v7  ;;  %1429 = vmatpush.xpose.msk.msra.mxu2 %vm248_vm0, %v238_v7 }
  0x29   : > { %1430 = vmatpush.xpose.msk.msra.mxu3 %vm248_vm0, %v238_v7  ;;  %v195_v7 = vld [vmem:[%s1529_s7 + $0xa8] sm:$0xff] }
  0x2b   : > { %1283 = vmatmul.msk.f32.vlgmr.msra.gmra.mxu0 %vm248_vm0, %v174_v8  ;;  %1314 = vmatmul.msk.f32.vlgmr.msra.gmra.mxu2 %vm248_vm0, %v205_v9  ;;  %v226_v8 = vld [vmem:[%s1529_s7 + $0x1a0] sm:$0xff] }
  0x2c   : > { %1346 = vmatmul.msk.f32.vlgmr.msra.gmra.mxu3 %vm248_vm0, %v237_v42 }
  0x2d   : > { %1431 = vmatpush.xpose.msk.msrb.mxu3 %vm738_vm1, %v247_v32  ;;  %v230_v32 = vld [vmem:[%s1529_s7 + $0x1c0] sm:$0xff] }
  0x31   : > { %1432 = vmatpush.xpose.msk.msrb.mxu3 %vm738_vm1, %v246_v33 }
  0x33   : > { %1284 = vmatmul.msk.f32.gmra.mxu0 %vm248_vm0, %v175_v10  ;;  %1315 = vmatmul.msk.f32.gmra.mxu2 %vm248_vm0, %v206_v11 }
  0x3b   : > { %1285 = vmatmul.msk.f32.gmra.mxu0 %vm248_vm0, %v176_v12  ;;  %1316 = vmatmul.msk.f32.gmra.mxu2 %vm248_vm0, %v207_v13  ;;  %v196_v13 = vld [vmem:[%s1529_s7 + $0xb0] sm:$0xff] }
  0x43   : > { %1286 = vmatmul.msk.f32.gmra.mxu0 %vm248_vm0, %v177_v14  ;;  %1317 = vmatmul.msk.f32.gmra.mxu2 %vm248_vm0, %v208_v15  ;;  %v227_v14 = vld [vmem:[%s1529_s7 + $0x1a8] sm:$0xff] }
  0x4b   : > { %1287 = vmatmul.msk.f32.gmra.mxu0 %vm248_vm0, %v178_v16  ;;  %1318 = vmatmul.msk.f32.gmra.mxu2 %vm248_vm0, %v209_v17 }
  0x53   : > { %1288 = vmatmul.msk.f32.gmra.mxu0 %vm248_vm0, %v179_v18  ;;  %1319 = vmatmul.msk.f32.gmra.mxu2 %vm248_vm0, %v210_v19  ;;  %v197_v19 = vld [vmem:[%s1529_s7 + $0xb8] sm:$0xff] }
  0x5b   : > { %1289 = vmatmul.msk.f32.gmra.mxu0 %vm248_vm0, %v180_v20  ;;  %1320 = vmatmul.msk.f32.gmra.mxu2 %vm248_vm0, %v211_v21  ;;  %v228_v20 = vld [vmem:[%s1529_s7 + $0x1b0] sm:$0xff] }
  0x63   : > { %1290 = vmatmul.msk.f32.gmra.mxu0 %vm248_vm0, %v181_v22  ;;  %1321 = vmatmul.msk.f32.gmra.mxu2 %vm248_vm0, %v212_v23 }
  0x6b   : > { %1291 = vmatmul.msk.f32.gmra.mxu0 %vm248_vm0, %v182_v24  ;;  %1322 = vmatmul.msk.f32.gmra.mxu2 %vm248_vm0, %v213_v25  ;;  %v198_v25 = vld [vmem:[%s1529_s7 + $0xc0] sm:$0xff] }
  0x73   : > { %1292 = vmatmul.msk.f32.gmra.mxu0 %vm248_vm0, %v183_v26  ;;  %1323 = vmatmul.msk.f32.gmra.mxu2 %vm248_vm0, %v214_v27  ;;  %v229_v26 = vld [vmem:[%s1529_s7 + $0x1b8] sm:$0xff] }
  0x7b   : > { %1293 = vmatmul.msk.f32.gmra.mxu0 %vm248_vm0, %v184_v28  ;;  %1324 = vmatmul.msk.f32.gmra.mxu2 %vm248_vm0, %v215_v29 }
  0x83   : > { %1294 = vmatmul.msk.f32.gmra.mxu0 %vm248_vm0, %v185_v30  ;;  %1325 = vmatmul.msk.f32.gmra.mxu2 %vm248_vm0, %v216_v31  ;;  %v199_v31 = vld [vmem:[%s1529_s7 + $0xc8] sm:$0xff] }
  0x8b   : > { %1295 = vmatmul.msk.f32.gmra.mxu0 %vm248_vm0, %v186_v34  ;;  %1326 = vmatmul.msk.f32.gmra.mxu2 %vm248_vm0, %v217_v35 }
  0x93   : > { %1296 = vmatmul.msk.f32.gmra.mxu0 %vm248_vm0, %v187_v36  ;;  %1327 = vmatmul.msk.f32.gmra.mxu2 %vm248_vm0, %v218_v37  ;;  %v200_v37 = vld [vmem:[%s1529_s7 + $0xd0] sm:$0xff] }
  0x9b   : > { %1297 = vmatmul.msk.f32.gmra.mxu0 %vm248_vm0, %v188_v38  ;;  %1328 = vmatmul.msk.f32.gmra.mxu2 %vm248_vm0, %v219_v39  ;;  %v231_v38 = vld [vmem:[%s1529_s7 + $0x1c8] sm:$0xff] }
  0xa3   : > { %1298 = vmatmul.msk.f32.gmra.mxu0 %vm248_vm0, %v189_v40  ;;  %1329 = vmatmul.msk.f32.gmra.mxu2 %vm248_vm0, %v220_v41 }
  0xa8   : > { %v482_v43 = vpop.f32.mrf.mxu0 }
  0xa9   : > { %v674_v46 = vmax.f32 %v482_v43, 0.0  ;;  %v201_v43 = vld [vmem:[%s1529_s7 + $0xd8] sm:$0xff] }
  0xab   : > { %1299 = vmatmul.msk.f32.gmra.mxu0 %vm248_vm0, %v190_v44  ;;  %1330 = vmatmul.msk.f32.gmra.mxu2 %vm248_vm0, %v221_v45  ;;  %v232_v44 = vld [vmem:[%s1529_s7 + $0x1d0] sm:$0xff] }
  0xac   : > { %1349 = vmatmul.msk.f32.vlgmr.msra.gmra.mxu1 %vm738_vm1, %v674_v46 }
  0xae   : > { %v1616_v47 = vpop.f32.mrf.mxu2 }
  0xb0   : > { %v485_v48 = vpop.f32.mrf.mxu0 }
  0xb1   : > { %v675_v51 = vmax.f32 %v485_v48, 0.0 }
  0xb3   : > { %1300 = vmatmul.msk.f32.gmra.mxu0 %vm248_vm0, %v191_v49  ;;  %1331 = vmatmul.msk.f32.gmra.mxu2 %vm248_vm0, %v222_v50  ;;  %v202_v50 = vld [vmem:[%s1529_s7 + $0xe0] sm:$0xff] }
  0xb4   : > { %1350 = vmatmul.msk.f32.gmra.mxu1 %vm738_vm1, %v675_v51  ;;  %v233_v51 = vld [vmem:[%s1529_s7 + $0x1d8] sm:$0xff] }
  0xb6   : > { %v1623_v52 = vpop.f32.mrf.mxu2 }
  0xb8   : > { %v488_v53 = vpop.f32.mrf.mxu0 }
  0xb9   : > { %v676_v56 = vmax.f32 %v488_v53, 0.0 }
  0xbb   : > { %1301 = vmatmul.msk.f32.gmra.mxu0 %vm248_vm0, %v192_v54  ;;  %1332 = vmatmul.msk.f32.gmra.mxu2 %vm248_vm0, %v223_v55 }
  0xbc   : > { %1351 = vmatmul.msk.f32.gmra.mxu1 %vm738_vm1, %v676_v56 }
  0xbe   : > { %v1630_v57 = vpop.f32.mrf.mxu2 }
  0xc0   : > { %v491_v58 = vpop.f32.mrf.mxu0 }
  0xc1   : > { %v677_v61 = vmax.f32 %v491_v58, 0.0  ;;  %v203_v58 = vld [vmem:[%s1529_s7 + $0xe8] sm:$0xff] }
  0xc3   : > { %1302 = vmatmul.msk.f32.gmra.mxu0 %vm248_vm0, %v193_v59  ;;  %1333 = vmatmul.msk.f32.gmra.mxu2 %vm248_vm0, %v224_v60  ;;  %v234_v59 = vld [vmem:[%s1529_s7 + $0x1e0] sm:$0xff] }
  0xc4   : > { %1352 = vmatmul.msk.f32.gmra.mxu1 %vm738_vm1, %v677_v61 }
  0xc6   : > { %v584_v62 = vpop.f32.mrf.mxu2 }
  0xc7   : > { %v708_v63 = vmax.f32 %v584_v62, 0.0 }
  0xc8   : > { %v494_v0 = vpop.f32.mrf.mxu0 }
  0xc9   : > { %v678_v3 = vmax.f32 %v494_v0, 0.0  ;;  %1383 = vmatmul.msk.f32.vlgmr.msrb.gmra.mxu3 %vm738_vm1, %v708_v63  ;;  %v204_v0 = vld [vmem:[%s1529_s7 + $0xf0] sm:$0xff] }
  0xcb   : > { %1303 = vmatmul.msk.f32.gmra.mxu0 %vm248_vm0, %v194_v1  ;;  %1334 = vmatmul.msk.f32.gmra.mxu2 %vm248_vm0, %v225_v2  ;;  %v235_v1 = vld [vmem:[%s1529_s7 + $0x1e8] sm:$0xff] }
  0xcc   : > { %1353 = vmatmul.msk.f32.gmra.mxu1 %vm738_vm1, %v678_v3 }
  0xce   : > { %v587_v4 = vpop.f32.mrf.mxu2 }
  0xcf   : > { %v709_v5 = vmax.f32 %v587_v4, 0.0 }
  0xd0   : > { %v497_v6 = vpop.f32.mrf.mxu0 }
  0xd1   : > { %v679_v9 = vmax.f32 %v497_v6, 0.0  ;;  %1384 = vmatmul.msk.f32.gmra.mxu3 %vm738_vm1, %v709_v5  ;;  %v236_v6 = vld [vmem:[%s1529_s7 + $0x1f0] sm:$0xff] }
  0xd3   : > { %1304 = vmatmul.msk.f32.gmra.mxu0 %vm248_vm0, %v195_v7  ;;  %1335 = vmatmul.msk.f32.gmra.mxu2 %vm248_vm0, %v226_v8 }
  0xd4   : > { %1354 = vmatmul.msk.f32.gmra.mxu1 %vm738_vm1, %v679_v9 }
  0xd6   : > { %v590_v10 = vpop.f32.mrf.mxu2 }
  0xd7   : > { %v710_v11 = vmax.f32 %v590_v10, 0.0 }
  0xd8   : > { %v500_v12 = vpop.f32.mrf.mxu0 }
  0xd9   : > { %v680_v15 = vmax.f32 %v500_v12, 0.0  ;;  %1385 = vmatmul.msk.f32.gmra.mxu3 %vm738_vm1, %v710_v11 }
  0xdb   : > { %1305 = vmatmul.msk.f32.gmra.mxu0 %vm248_vm0, %v196_v13  ;;  %1336 = vmatmul.msk.f32.gmra.mxu2 %vm248_vm0, %v227_v14 }
  0xdc   : > { %1355 = vmatmul.msk.f32.gmra.mxu1 %vm738_vm1, %v680_v15 }
  0xde   : > { %v593_v16 = vpop.f32.mrf.mxu2 }
  0xdf   : > { %v711_v17 = vmax.f32 %v593_v16, 0.0 }
  0xe0   : > { %v503_v18 = vpop.f32.mrf.mxu0 }
  0xe1   : > { %v681_v21 = vmax.f32 %v503_v18, 0.0  ;;  %1386 = vmatmul.msk.f32.gmra.mxu3 %vm738_vm1, %v711_v17 }
  0xe3   : > { %1306 = vmatmul.msk.f32.gmra.mxu0 %vm248_vm0, %v197_v19  ;;  %1337 = vmatmul.msk.f32.gmra.mxu2 %vm248_vm0, %v228_v20 }
  0xe4   : > { %1356 = vmatmul.msk.f32.gmra.mxu1 %vm738_vm1, %v681_v21 }
  0xe6   : > { %v596_v22 = vpop.f32.mrf.mxu2 }
  0xe7   : > { %v712_v23 = vmax.f32 %v596_v22, 0.0 }
  0xe8   : > { %v506_v24 = vpop.f32.mrf.mxu0 }
  0xe9   : > { %v682_v27 = vmax.f32 %v506_v24, 0.0  ;;  %1387 = vmatmul.msk.f32.gmra.mxu3 %vm738_vm1, %v712_v23 }
  0xeb   : > { %1307 = vmatmul.msk.f32.gmra.mxu0 %vm248_vm0, %v198_v25  ;;  %1338 = vmatmul.msk.f32.gmra.mxu2 %vm248_vm0, %v229_v26 }
  0xec   : > { %1357 = vmatmul.msk.f32.gmra.mxu1 %vm738_vm1, %v682_v27 }
  0xee   : > { %v599_v28 = vpop.f32.mrf.mxu2 }
  0xef   : > { %v713_v29 = vmax.f32 %v599_v28, 0.0  ;;  %v1729_v28 = vpop.f32.mrf.mxu3 }
  0xf0   : > { %v509_v30 = vpop.f32.mrf.mxu0 }
  0xf1   : > { %v683_v33 = vmax.f32 %v509_v30, 0.0  ;;  %1388 = vmatmul.msk.f32.gmra.mxu3 %vm738_vm1, %v713_v29 }
  0xf3   : > { %1308 = vmatmul.msk.f32.gmra.mxu0 %vm248_vm0, %v199_v31  ;;  %1339 = vmatmul.msk.f32.gmra.mxu2 %vm248_vm0, %v230_v32 }
  0xf4   : > { %1358 = vmatmul.msk.f32.gmra.mxu1 %vm738_vm1, %v683_v33 }
  0xf6   : > { %v602_v34 = vpop.f32.mrf.mxu2 }
  0xf7   : > { %v714_v35 = vmax.f32 %v602_v34, 0.0 }
  0xf8   : > { %v512_v36 = vpop.f32.mrf.mxu0 }
  0xf9   : > { %v684_v39 = vmax.f32 %v512_v36, 0.0  ;;  %1389 = vmatmul.msk.f32.gmra.mxu3 %vm738_vm1, %v714_v35 }
  0xfb   : > { %1309 = vmatmul.msk.f32.gmra.mxu0 %vm248_vm0, %v200_v37  ;;  %1340 = vmatmul.msk.f32.gmra.mxu2 %vm248_vm0, %v231_v38 }
  0xfc   : > { %1359 = vmatmul.msk.f32.gmra.mxu1 %vm738_vm1, %v684_v39 }
  0xfe   : > { %v605_v40 = vpop.f32.mrf.mxu2 }
  0xff   : > { %v715_v41 = vmax.f32 %v605_v40, 0.0 }
 0x100   : > { %v515_v42 = vpop.f32.mrf.mxu0 }
 0x101   : > { %v685_v45 = vmax.f32 %v515_v42, 0.0  ;;  %1390 = vmatmul.msk.f32.gmra.mxu3 %vm738_vm1, %v715_v41 }
 0x103   : > { %1310 = vmatmul.msk.f32.gmra.mxu0 %vm248_vm0, %v201_v43  ;;  %1341 = vmatmul.msk.f32.gmra.mxu2 %vm248_vm0, %v232_v44 }
 0x104   : > { %1360 = vmatmul.msk.f32.gmra.mxu1 %vm738_vm1, %v685_v45 }
 0x106   : > { %v608_v46 = vpop.f32.mrf.mxu2 }
 0x107   : > { %v716_v48 = vmax.f32 %v608_v46, 0.0 }
 0x108   : > { %v518_v49 = vpop.f32.mrf.mxu0 }
 0x109   : > { %v686_v53 = vmax.f32 %v518_v49, 0.0  ;;  %1391 = vmatmul.msk.f32.gmra.mxu3 %vm738_vm1, %v716_v48 }
 0x10b   : > { %1311 = vmatmul.msk.f32.gmra.mxu0 %vm248_vm0, %v202_v50  ;;  %1342 = vmatmul.msk.f32.gmra.mxu2 %vm248_vm0, %v233_v51 }
 0x10c   : > { %1361 = vmatmul.msk.f32.gmra.mxu1 %vm738_vm1, %v686_v53 }
 0x10e   : > { %v611_v54 = vpop.f32.mrf.mxu2 }
 0x10f   : > { %v717_v55 = vmax.f32 %v611_v54, 0.0 }
 0x110   : > { %v521_v56 = vpop.f32.mrf.mxu0 }
 0x111   : > { %v687_v60 = vmax.f32 %v521_v56, 0.0  ;;  %1392 = vmatmul.msk.f32.gmra.mxu3 %vm738_vm1, %v717_v55 }
 0x113   : > { %1312 = vmatmul.msk.f32.gmra.mxu0 %vm248_vm0, %v203_v58  ;;  %1343 = vmatmul.msk.f32.gmra.mxu2 %vm248_vm0, %v234_v59 }
 0x114   : > { %1362 = vmatmul.msk.f32.gmra.mxu1 %vm738_vm1, %v687_v60 }
 0x116   : > { %v614_v61 = vpop.f32.mrf.mxu2 }
 0x117   : > { %v718_v62 = vmax.f32 %v614_v61, 0.0 }
 0x118   : > { %v524_v63 = vpop.f32.mrf.mxu0 }
 0x119   : > { %v688_v2 = vmax.f32 %v524_v63, 0.0  ;;  %1393 = vmatmul.msk.f32.gmra.mxu3 %vm738_vm1, %v718_v62 }
 0x11b   : > { %1313 = vmatmul.msk.f32.gmra.mxu0 %vm248_vm0, %v204_v0  ;;  %1344 = vmatmul.msk.f32.gmra.mxu2 %vm248_vm0, %v235_v1 }
 0x11c   : > { %1363 = vmatmul.msk.f32.gmra.mxu1 %vm738_vm1, %v688_v2 }
 0x11e   : > { %v617_v3 = vpop.f32.mrf.mxu2 }
 0x11f   : > { %v719_v4 = vmax.f32 %v617_v3, 0.0 }
 0x120   : > { %v527_v5 = vpop.f32.mrf.mxu0 }
 0x121   : > { %v689_v7 = vmax.f32 %v527_v5, 0.0  ;;  %1394 = vmatmul.msk.f32.gmra.mxu3 %vm738_vm1, %v719_v4 }
 0x123   : > { %1345 = vmatmul.msk.f32.gmra.mxu2 %vm248_vm0, %v236_v6 }
 0x124   : > { %1364 = vmatmul.msk.f32.gmra.mxu1 %vm738_vm1, %v689_v7 }
 0x126   : > { %v620_v8 = vpop.f32.mrf.mxu2 }
 0x127   : > { %v720_v9 = vmax.f32 %v620_v8, 0.0 }
 0x128   : > { %v530_v10 = vpop.f32.mrf.mxu0 }
 0x129   : > { %v690_v11 = vmax.f32 %v530_v10, 0.0  ;;  %v954_v12 = vpop.f32.mrf.mxu1  ;;  %1395 = vmatmul.msk.f32.gmra.mxu3 %vm738_vm1, %v720_v9 }
 0x12a   : > { %1146 = vst.msk [vmem:[%s1712_s15] sm:$0xff] %vm248_vm0, %v954_v12 }
 0x12c   : > { %1365 = vmatmul.msk.f32.gmra.mxu1 %vm738_vm1, %v690_v11 }
 0x12e   : > { %v623_v13 = vpop.f32.mrf.mxu2 }
 0x12f   : > { %v721_v14 = vmax.f32 %v623_v13, 0.0 }
 0x130   : > { %v533_v15 = vpop.f32.mrf.mxu0 }
 0x131   : > { %v691_v16 = vmax.f32 %v533_v15, 0.0  ;;  %v957_v17 = vpop.f32.mrf.mxu1  ;;  %1396 = vmatmul.msk.f32.gmra.mxu3 %vm738_vm1, %v721_v14 }
 0x132   : > { %1147 = vst.msk [vmem:[%s1712_s15 + $0x8] sm:$0xff] %vm248_vm0, %v957_v17 }
 0x134   : > { %1366 = vmatmul.msk.f32.gmra.mxu1 %vm738_vm1, %v691_v16 }
 0x136   : > { %v626_v18 = vpop.f32.mrf.mxu2 }
 0x137   : > { %v722_v19 = vmax.f32 %v626_v18, 0.0 }
 0x138   : > { %v536_v20 = vpop.f32.mrf.mxu0 }
 0x139   : > { %v692_v21 = vmax.f32 %v536_v20, 0.0  ;;  %v960_v22 = vpop.f32.mrf.mxu1  ;;  %1397 = vmatmul.msk.f32.gmra.mxu3 %vm738_vm1, %v722_v19 }
 0x13a   : > { %1148 = vst.msk [vmem:[%s1712_s15 + $0x10] sm:$0xff] %vm248_vm0, %v960_v22 }
 0x13c   : > { %1367 = vmatmul.msk.f32.gmra.mxu1 %vm738_vm1, %v692_v21 }
 0x13e   : > { %v629_v23 = vpop.f32.mrf.mxu2 }
 0x13f   : > { %v723_v24 = vmax.f32 %v629_v23, 0.0 }
 0x140   : > { %v539_v25 = vpop.f32.mrf.mxu0 }
 0x141   : > { %v693_v26 = vmax.f32 %v539_v25, 0.0  ;;  %v963_v27 = vpop.f32.mrf.mxu1  ;;  %1398 = vmatmul.msk.f32.gmra.mxu3 %vm738_vm1, %v723_v24 }
 0x142   : > { %1149 = vst.msk [vmem:[%s1712_s15 + $0x18] sm:$0xff] %vm248_vm0, %v963_v27 }
 0x144   : > { %1368 = vmatmul.msk.f32.gmra.mxu1 %vm738_vm1, %v693_v26 }
 0x146   : > { %v632_v29 = vpop.f32.mrf.mxu2 }
 0x147   : > { %v724_v30 = vmax.f32 %v632_v29, 0.0 }
 0x148   : > { %v542_v31 = vpop.f32.mrf.mxu0 }
 0x149   : > { %v694_v32 = vmax.f32 %v542_v31, 0.0  ;;  %v966_v33 = vpop.f32.mrf.mxu1  ;;  %1399 = vmatmul.msk.f32.gmra.mxu3 %vm738_vm1, %v724_v30 }
 0x14a   : > { %1150 = vst.msk [vmem:[%s1712_s15 + $0x20] sm:$0xff] %vm248_vm0, %v966_v33 }
 0x14c   : > { %1369 = vmatmul.msk.f32.gmra.mxu1 %vm738_vm1, %v694_v32  ;;  %v1056_v34 = vpop.f32.mrf.mxu3 }
 0x14d   : > { %1180 = vst.msk [vmem:[%s1712_s15 + $0x110] sm:$0xff] %vm248_vm0, %v1056_v34 }
 0x14e   : > { %v635_v35 = vpop.f32.mrf.mxu2 }
 0x14f   : > { %v725_v36 = vmax.f32 %v635_v35, 0.0 }
 0x150   : > { %v545_v37 = vpop.f32.mrf.mxu0 }
 0x151   : > { %v695_v38 = vmax.f32 %v545_v37, 0.0  ;;  %v969_v39 = vpop.f32.mrf.mxu1  ;;  %1400 = vmatmul.msk.f32.gmra.mxu3 %vm738_vm1, %v725_v36 }
 0x152   : > { %1151 = vst.msk [vmem:[%s1712_s15 + $0x28] sm:$0xff] %vm248_vm0, %v969_v39 }
 0x154   : > { %1370 = vmatmul.msk.f32.gmra.mxu1 %vm738_vm1, %v695_v38  ;;  %v1059_v40 = vpop.f32.mrf.mxu3  ;;  %v705_v38 = vmax.f32 %v1616_v47, 0.0 }
 0x155   : > { %1181 = vst.msk [vmem:[%s1712_s15 + $0x118] sm:$0xff] %vm248_vm0, %v1059_v40 }
 0x156   : > { %v638_v41 = vpop.f32.mrf.mxu2 }
 0x157   : > { %v726_v42 = vmax.f32 %v638_v41, 0.0 }
 0x158   : > { %v548_v43 = vpop.f32.mrf.mxu0 }
 0x159   : > { %v696_v44 = vmax.f32 %v548_v43, 0.0  ;;  %v972_v45 = vpop.f32.mrf.mxu1  ;;  %1401 = vmatmul.msk.f32.gmra.mxu3 %vm738_vm1, %v726_v42  ;;  %v706_v43 = vmax.f32 %v1623_v52, 0.0 }
 0x15a   : > { %1152 = vst.msk [vmem:[%s1712_s15 + $0x30] sm:$0xff] %vm248_vm0, %v972_v45 }
 0x15c   : > { %1371 = vmatmul.msk.f32.gmra.mxu1 %vm738_vm1, %v696_v44  ;;  %v1062_v46 = vpop.f32.mrf.mxu3  ;;  %v737_v44 = vmax.f32 %v1729_v28, 0.0 }
 0x15d   : > { %1182 = vst.msk [vmem:[%s1712_s15 + $0x120] sm:$0xff] %vm248_vm0, %v1062_v46  ;;  %v707_v46 = vmax.f32 %v1630_v57, 0.0 }
 0x15e   : > { %v641_v48 = vpop.f32.mrf.mxu2 }
 0x15f   : > { %v727_v49 = vmax.f32 %v641_v48, 0.0 }
 0x160   : > { %v551_v50 = vpop.f32.mrf.mxu0 }
 0x161   : > { %v697_v51 = vmax.f32 %v551_v50, 0.0  ;;  %v975_v53 = vpop.f32.mrf.mxu1  ;;  %1402 = vmatmul.msk.f32.gmra.mxu3 %vm738_vm1, %v727_v49 }
 0x162   : > { %1153 = vst.msk [vmem:[%s1712_s15 + $0x38] sm:$0xff] %vm248_vm0, %v975_v53 }
 0x164   : > { %1372 = vmatmul.msk.f32.gmra.mxu1 %vm738_vm1, %v697_v51  ;;  %v1065_v54 = vpop.f32.mrf.mxu3 }
 0x165   : > { %1183 = vst.msk [vmem:[%s1712_s15 + $0x128] sm:$0xff] %vm248_vm0, %v1065_v54 }
 0x166   : > { %v644_v55 = vpop.f32.mrf.mxu2 }
 0x167   : > { %v728_v56 = vmax.f32 %v644_v55, 0.0 }
 0x168   : > { %v554_v58 = vpop.f32.mrf.mxu0 }
 0x169   : > { %v698_v59 = vmax.f32 %v554_v58, 0.0  ;;  %v978_v60 = vpop.f32.mrf.mxu1  ;;  %1403 = vmatmul.msk.f32.gmra.mxu3 %vm738_vm1, %v728_v56 }
 0x16a   : > { %1154 = vst.msk [vmem:[%s1712_s15 + $0x40] sm:$0xff] %vm248_vm0, %v978_v60 }
 0x16c   : > { %1373 = vmatmul.msk.f32.gmra.mxu1 %vm738_vm1, %v698_v59  ;;  %v1068_v61 = vpop.f32.mrf.mxu3 }
 0x16d   : > { %1184 = vst.msk [vmem:[%s1712_s15 + $0x130] sm:$0xff] %vm248_vm0, %v1068_v61 }
 0x16e   : > { %v647_v62 = vpop.f32.mrf.mxu2 }
 0x16f   : > { %v729_v63 = vmax.f32 %v647_v62, 0.0 }
 0x170   : > { %v557_v0 = vpop.f32.mrf.mxu0 }
 0x171   : > { %v699_v1 = vmax.f32 %v557_v0, 0.0  ;;  %v981_v2 = vpop.f32.mrf.mxu1  ;;  %1404 = vmatmul.msk.f32.gmra.mxu3 %vm738_vm1, %v729_v63 }
 0x172   : > { %1155 = vst.msk [vmem:[%s1712_s15 + $0x48] sm:$0xff] %vm248_vm0, %v981_v2 }
 0x174   : > { %1374 = vmatmul.msk.f32.gmra.mxu1 %vm738_vm1, %v699_v1  ;;  %v1071_v3 = vpop.f32.mrf.mxu3 }
 0x175   : > { %1185 = vst.msk [vmem:[%s1712_s15 + $0x138] sm:$0xff] %vm248_vm0, %v1071_v3 }
 0x176   : > { %v650_v4 = vpop.f32.mrf.mxu2 }
 0x177   : > { %v730_v5 = vmax.f32 %v650_v4, 0.0 }
 0x178   : > { %v560_v6 = vpop.f32.mrf.mxu0 }
 0x179   : > { %v700_v7 = vmax.f32 %v560_v6, 0.0  ;;  %v984_v8 = vpop.f32.mrf.mxu1  ;;  %1405 = vmatmul.msk.f32.gmra.mxu3 %vm738_vm1, %v730_v5 }
 0x17a   : > { %1156 = vst.msk [vmem:[%s1712_s15 + $0x50] sm:$0xff] %vm248_vm0, %v984_v8 }
 0x17c   : > { %1375 = vmatmul.msk.f32.gmra.mxu1 %vm738_vm1, %v700_v7  ;;  %v1074_v9 = vpop.f32.mrf.mxu3 }
 0x17d   : > { %1186 = vst.msk [vmem:[%s1712_s15 + $0x140] sm:$0xff] %vm248_vm0, %v1074_v9 }
 0x17e   : > { %v653_v10 = vpop.f32.mrf.mxu2 }
 0x17f   : > { %v731_v11 = vmax.f32 %v653_v10, 0.0 }
 0x180   : > { %v563_v12 = vpop.f32.mrf.mxu0 }
 0x181   : > { %v701_v13 = vmax.f32 %v563_v12, 0.0  ;;  %v987_v14 = vpop.f32.mrf.mxu1  ;;  %1406 = vmatmul.msk.f32.gmra.mxu3 %vm738_vm1, %v731_v11 }
 0x182   : > { %1157 = vst.msk [vmem:[%s1712_s15 + $0x58] sm:$0xff] %vm248_vm0, %v987_v14 }
 0x184   : > { %1376 = vmatmul.msk.f32.gmra.mxu1 %vm738_vm1, %v701_v13  ;;  %v1077_v15 = vpop.f32.mrf.mxu3 }
 0x185   : > { %1187 = vst.msk [vmem:[%s1712_s15 + $0x148] sm:$0xff] %vm248_vm0, %v1077_v15 }
 0x186   : > { %v656_v16 = vpop.f32.mrf.mxu2 }
 0x187   : > { %v732_v17 = vmax.f32 %v656_v16, 0.0 }
 0x188   : > { %v566_v18 = vpop.f32.mrf.mxu0 }
 0x189   : > { %v702_v19 = vmax.f32 %v566_v18, 0.0  ;;  %v990_v20 = vpop.f32.mrf.mxu1  ;;  %1407 = vmatmul.msk.f32.gmra.mxu3 %vm738_vm1, %v732_v17 }
 0x18a   : > { %1158 = vst.msk [vmem:[%s1712_s15 + $0x60] sm:$0xff] %vm248_vm0, %v990_v20 }
 0x18c   : > { %1377 = vmatmul.msk.f32.gmra.mxu1 %vm738_vm1, %v702_v19  ;;  %v1080_v21 = vpop.f32.mrf.mxu3 }
 0x18d   : > { %1188 = vst.msk [vmem:[%s1712_s15 + $0x150] sm:$0xff] %vm248_vm0, %v1080_v21 }
 0x18e   : > { %v659_v22 = vpop.f32.mrf.mxu2 }
 0x18f   : > { %v733_v23 = vmax.f32 %v659_v22, 0.0 }
 0x190   : > { %v569_v24 = vpop.f32.mrf.mxu0 }
 0x191   : > { %v703_v25 = vmax.f32 %v569_v24, 0.0  ;;  %v993_v26 = vpop.f32.mrf.mxu1  ;;  %1408 = vmatmul.msk.f32.gmra.mxu3 %vm738_vm1, %v733_v23 }
 0x192   : > { %1159 = vst.msk [vmem:[%s1712_s15 + $0x68] sm:$0xff] %vm248_vm0, %v993_v26 }
 0x194   : > { %1378 = vmatmul.msk.f32.gmra.mxu1 %vm738_vm1, %v703_v25  ;;  %v1083_v27 = vpop.f32.mrf.mxu3 }
 0x195   : > { %1189 = vst.msk [vmem:[%s1712_s15 + $0x158] sm:$0xff] %vm248_vm0, %v1083_v27 }
 0x196   : > { %v662_v29 = vpop.f32.mrf.mxu2 }
 0x197   : > { %v734_v30 = vmax.f32 %v662_v29, 0.0 }
 0x198   : > { %v572_v31 = vpop.f32.mrf.mxu0 }
 0x199   : > { %v704_v32 = vmax.f32 %v572_v31, 0.0  ;;  %v996_v33 = vpop.f32.mrf.mxu1  ;;  %1409 = vmatmul.msk.f32.gmra.mxu3 %vm738_vm1, %v734_v30 }
 0x19a   : > { %1160 = vst.msk [vmem:[%s1712_s15 + $0x70] sm:$0xff] %vm248_vm0, %v996_v33 }
 0x19c   : > { %1379 = vmatmul.msk.f32.gmra.mxu1 %vm738_vm1, %v704_v32  ;;  %v1086_v34 = vpop.f32.mrf.mxu3 }
 0x19d   : > { %1190 = vst.msk [vmem:[%s1712_s15 + $0x160] sm:$0xff] %vm248_vm0, %v1086_v34 }
 0x19e   : > { %v665_v35 = vpop.f32.mrf.mxu2 }
 0x19f   : > { %v735_v36 = vmax.f32 %v665_v35, 0.0 }
 0x1a1   : > { %v999_v37 = vpop.f32.mrf.mxu1  ;;  %1410 = vmatmul.msk.f32.gmra.mxu3 %vm738_vm1, %v735_v36 }
 0x1a2   : > { %1161 = vst.msk [vmem:[%s1712_s15 + $0x78] sm:$0xff] %vm248_vm0, %v999_v37 }
 0x1a4   : > { %1380 = vmatmul.msk.f32.gmra.mxu1 %vm738_vm1, %v705_v38  ;;  %v1089_v39 = vpop.f32.mrf.mxu3 }
 0x1a5   : > { %1191 = vst.msk [vmem:[%s1712_s15 + $0x168] sm:$0xff] %vm248_vm0, %v1089_v39 }
 0x1a6   : > { %v668_v40 = vpop.f32.mrf.mxu2 }
 0x1a7   : > { %v736_v41 = vmax.f32 %v668_v40, 0.0 }
 0x1a9   : > { %v1002_v42 = vpop.f32.mrf.mxu1  ;;  %1411 = vmatmul.msk.f32.gmra.mxu3 %vm738_vm1, %v736_v41 }
 0x1aa   : > { %1162 = vst.msk [vmem:[%s1712_s15 + $0x80] sm:$0xff] %vm248_vm0, %v1002_v42 }
 0x1ac   : > { %1381 = vmatmul.msk.f32.gmra.mxu1 %vm738_vm1, %v706_v43  ;;  %v1092_v47 = vpop.f32.mrf.mxu3 }
 0x1ad   : > { %1192 = vst.msk [vmem:[%s1712_s15 + $0x170] sm:$0xff] %vm248_vm0, %v1092_v47 }
 0x1b1   : > { %v1005_v45 = vpop.f32.mrf.mxu1  ;;  %1412 = vmatmul.msk.f32.gmra.mxu3 %vm738_vm1, %v737_v44 }
 0x1b2   : > { %1163 = vst.msk [vmem:[%s1712_s15 + $0x88] sm:$0xff] %vm248_vm0, %v1005_v45 }
 0x1b4   : > { %1382 = vmatmul.msk.f32.gmra.mxu1 %vm738_vm1, %v707_v46  ;;  %v1095_v52 = vpop.f32.mrf.mxu3 }
 0x1b5   : > { %1193 = vst.msk [vmem:[%s1712_s15 + $0x178] sm:$0xff] %vm248_vm0, %v1095_v52 }
 0x1b9   : > { %v1008_v48 = vpop.f32.mrf.mxu1 }
 0x1ba   : > { %1164 = vst.msk [vmem:[%s1712_s15 + $0x90] sm:$0xff] %vm248_vm0, %v1008_v48 }
 0x1bc   : > { %v1098_v28 = vpop.f32.mrf.mxu3 }
 0x1bd   : > { %1194 = vst.msk [vmem:[%s1712_s15 + $0x180] sm:$0xff] %vm248_vm0, %v1098_v28 }
 0x1c1   : > { %v1011_v49 = vpop.f32.mrf.mxu1 }
 0x1c2   : > { %1165 = vst.msk [vmem:[%s1712_s15 + $0x98] sm:$0xff] %vm248_vm0, %v1011_v49 }
 0x1c4   : > { %v1101_v57 = vpop.f32.mrf.mxu3 }
 0x1c5   : > { %1195 = vst.msk [vmem:[%s1712_s15 + $0x188] sm:$0xff] %vm248_vm0, %v1101_v57 }
 0x1c9   : > { %v1014_v50 = vpop.f32.mrf.mxu1 }
 0x1ca   : > { %1166 = vst.msk [vmem:[%s1712_s15 + $0xa0] sm:$0xff] %vm248_vm0, %v1014_v50 }
 0x1cc   : > { %v1104_v51 = vpop.f32.mrf.mxu3 }
 0x1cd   : > { %1196 = vst.msk [vmem:[%s1712_s15 + $0x190] sm:$0xff] %vm248_vm0, %v1104_v51 }
 0x1d1   : > { %v1017_v53 = vpop.f32.mrf.mxu1 }
 0x1d2   : > { %1167 = vst.msk [vmem:[%s1712_s15 + $0xa8] sm:$0xff] %vm248_vm0, %v1017_v53 }
 0x1d4   : > { %v1107_v54 = vpop.f32.mrf.mxu3 }
 0x1d5   : > { %1197 = vst.msk [vmem:[%s1712_s15 + $0x198] sm:$0xff] %vm248_vm0, %v1107_v54 }
 0x1d9   : > { %v1020_v55 = vpop.f32.mrf.mxu1 }
 0x1da   : > { %1168 = vst.msk [vmem:[%s1712_s15 + $0xb0] sm:$0xff] %vm248_vm0, %v1020_v55 }
 0x1dc   : > { %v1110_v56 = vpop.f32.mrf.mxu3 }
 0x1dd   : > { %1198 = vst.msk [vmem:[%s1712_s15 + $0x1a0] sm:$0xff] %vm248_vm0, %v1110_v56 }
 0x1e1   : > { %v1023_v58 = vpop.f32.mrf.mxu1 }
 0x1e2   : > { %1169 = vst.msk [vmem:[%s1712_s15 + $0xb8] sm:$0xff] %vm248_vm0, %v1023_v58 }
 0x1e4   : > { %v1113_v59 = vpop.f32.mrf.mxu3 }
 0x1e5   : > { %1199 = vst.msk [vmem:[%s1712_s15 + $0x1a8] sm:$0xff] %vm248_vm0, %v1113_v59 }
 0x1e9   : > { %v1026_v60 = vpop.f32.mrf.mxu1 }
 0x1ea   : > { %1170 = vst.msk [vmem:[%s1712_s15 + $0xc0] sm:$0xff] %vm248_vm0, %v1026_v60 }
 0x1ec   : > { %v1116_v61 = vpop.f32.mrf.mxu3 }
 0x1ed   : > { %1200 = vst.msk [vmem:[%s1712_s15 + $0x1b0] sm:$0xff] %vm248_vm0, %v1116_v61 }
 0x1f1   : > { %v1029_v62 = vpop.f32.mrf.mxu1 }
 0x1f2   : > { %1171 = vst.msk [vmem:[%s1712_s15 + $0xc8] sm:$0xff] %vm248_vm0, %v1029_v62 }
 0x1f4   : > { %v1119_v63 = vpop.f32.mrf.mxu3 }
 0x1f5   : > { %1201 = vst.msk [vmem:[%s1712_s15 + $0x1b8] sm:$0xff] %vm248_vm0, %v1119_v63 }
 0x1f9   : > { %v1032_v0 = vpop.f32.mrf.mxu1 }
 0x1fa   : > { %1172 = vst.msk [vmem:[%s1712_s15 + $0xd0] sm:$0xff] %vm248_vm0, %v1032_v0 }
 0x1fc   : > { %v1122_v1 = vpop.f32.mrf.mxu3 }
 0x1fd   : > { %1202 = vst.msk [vmem:[%s1712_s15 + $0x1c0] sm:$0xff] %vm248_vm0, %v1122_v1 }
 0x201   : > { %v1035_v2 = vpop.f32.mrf.mxu1 }
 0x202   : > { %1173 = vst.msk [vmem:[%s1712_s15 + $0xd8] sm:$0xff] %vm248_vm0, %v1035_v2 }
 0x204   : > { %v1125_v3 = vpop.f32.mrf.mxu3 }
 0x205   : > { %1203 = vst.msk [vmem:[%s1712_s15 + $0x1c8] sm:$0xff] %vm248_vm0, %v1125_v3 }
 0x209   : > { %v1038_v4 = vpop.f32.mrf.mxu1 }
 0x20a   : > { %1174 = vst.msk [vmem:[%s1712_s15 + $0xe0] sm:$0xff] %vm248_vm0, %v1038_v4 }
 0x20c   : > { %v1128_v5 = vpop.f32.mrf.mxu3 }
 0x20d   : > { %1204 = vst.msk [vmem:[%s1712_s15 + $0x1d0] sm:$0xff] %vm248_vm0, %v1128_v5 }
 0x211   : > { %v1041_v6 = vpop.f32.mrf.mxu1 }
 0x212   : > { %1175 = vst.msk [vmem:[%s1712_s15 + $0xe8] sm:$0xff] %vm248_vm0, %v1041_v6 }
 0x214   : > { %v1131_v7 = vpop.f32.mrf.mxu3 }
 0x215   : > { %1205 = vst.msk [vmem:[%s1712_s15 + $0x1d8] sm:$0xff] %vm248_vm0, %v1131_v7 }
 0x219   : > { %v1044_v8 = vpop.f32.mrf.mxu1 }
 0x21a   : > { %1176 = vst.msk [vmem:[%s1712_s15 + $0xf0] sm:$0xff] %vm248_vm0, %v1044_v8 }
 0x21c   : > { %v1134_v9 = vpop.f32.mrf.mxu3 }
 0x21d   : > { %1206 = vst.msk [vmem:[%s1712_s15 + $0x1e0] sm:$0xff] %vm248_vm0, %v1134_v9 }
 0x221   : > { %v1047_v10 = vpop.f32.mrf.mxu1 }
 0x222   : > { %1177 = vst.msk [vmem:[%s1712_s15 + $0xf8] sm:$0xff] %vm248_vm0, %v1047_v10 }
 0x224   : > { %v1137_v11 = vpop.f32.mrf.mxu3 }
 0x225   : > { %1207 = vst.msk [vmem:[%s1712_s15 + $0x1e8] sm:$0xff] %vm248_vm0, %v1137_v11 }
 0x229   : > { %v1050_v12 = vpop.f32.mrf.mxu1 }
 0x22a   : > { %1178 = vst.msk [vmem:[%s1712_s15 + $0x100] sm:$0xff] %vm248_vm0, %v1050_v12 }
 0x22c   : > { %v1140_v13 = vpop.f32.mrf.mxu3 }
 0x22d   : > { %1208 = vst.msk [vmem:[%s1712_s15 + $0x1f0] sm:$0xff] %vm248_vm0, %v1140_v13 }
 0x231   : > { %v1053_v14 = vpop.f32.mrf.mxu1 }
 0x232   : > { %1179 = vst.msk [vmem:[%s1712_s15 + $0x108] sm:$0xff] %vm248_vm0, %v1053_v14 }
 0x234   : > { %v1143_v15 = vpop.f32.mrf.mxu3 }
 0x235   : > { %1209 = vst.msk [vmem:[%s1712_s15 + $0x1f8] sm:$0xff] %vm248_vm0, %v1143_v15 }
 0x236 PF: > { %s13_s12 = sadd.s32 1, %s1447_s12  }
 0x237   : > { %p10_p4 = scmp.ge.s32.totalorder %s13_s12, 6  }
 0x239   :  { %12 = sbr.rel (!%p10_p4) target bundleno = 1 (0x1), region = 62 }

</bundles_post_ra>
